<compile_context>
chip_gen: v6e
topology: v6e:2x2x1
jax: 0.10.0
libtpu: 0.0.40
codegen_flags: <defaults>
</compile_context>

<pallas_src>
import functools

import jax
import jax.numpy as jnp
from jax.experimental import pallas as pl
from jax.experimental.pallas import tpu as pltpu


def _round_up(v, m):
    return (v + m - 1) // m * m


def _conv_bn_relu_kernel(p_ref, w_ref, b_ref, o_ref):
    # p_ref: (1, Kdim, tile_m) bf16 patch tile (K on sublanes, M on lanes)
    # w_ref: (C2, Kdim)        bf16 weights with BN scale folded (grid-resident)
    # b_ref: (C2, 1)           f32  folded BN bias
    # o_ref: (1, C2, tile_m)   output tile: C2 on sublanes, M lane-dense
    acc = jnp.dot(w_ref[...], p_ref[0], preferred_element_type=jnp.float32)
    o_ref[0] = jnp.maximum(acc + b_ref[...], 0.0).astype(o_ref.dtype)


def conv_bn_relu(x, weight, gamma, beta, running_mean, running_var,
                 *, stride=1, padding=0, dilation=1, eps=1e-5,
                 max_tile_m=2048):
    """x: (N, C1, H, W) NCHW float32. weight: (C2, C1, Kh, Kw). Returns NCHW."""
    N, C1, H, W = x.shape
    C2, _, Kh, Kw = weight.shape
    s, p, d = stride, padding, dilation
    Ho = (H + 2 * p - d * (Kh - 1) - 1) // s + 1
    Wo = (W + 2 * p - d * (Kw - 1) - 1) // s + 1
    Kdim = C1 * Kh * Kw
    Msp = Ho * Wo                                   # output pixels per image

    # ---- fold eval-mode BN into the weights (f32 math, then bf16 cast) ----
    scale = gamma / jnp.sqrt(running_var + eps)                  # (C2,)
    bias = (beta - running_mean * scale).astype(jnp.float32)     # (C2,)
    w2 = weight.transpose(0, 2, 3, 1).reshape(C2, Kdim)          # (kh,kw,c1)-major
    w2 = (w2 * scale[:, None]).astype(jnp.bfloat16)              # (C2, Kdim) bf16
    bias2 = bias.reshape(C2, 1)                                  # (C2, 1) f32

    # ---- NCHW-native, K-major im2col: pad + strided slices + concat ----
    xb = x.astype(jnp.bfloat16)
    xp = jnp.pad(xb, ((0, 0), (0, 0), (p, p), (p, p)))
    cols = []
    for kh in range(Kh):
        for kw in range(Kw):
            cols.append(xp[:, :,
                           kh * d: kh * d + s * (Ho - 1) + 1: s,
                           kw * d: kw * d + s * (Wo - 1) + 1: s])
    patches = jnp.concatenate(cols, axis=1)          # (N, Kh*Kw*C1, Ho, Wo)
    patches = patches.reshape(N, Kdim, Msp)          # (N, Kdim, M), no K padding

    # ---- grid: (batch, M tiles); largest tile that fits, no forced split ----
    if Msp <= max_tile_m:
        tile_m = Msp                                 # full dim: always legal
        Mp = Msp
    else:
        tile_m = max_tile_m                          # multiple of 128
        Mp = _round_up(Msp, tile_m)
        patches = jnp.pad(patches, ((0, 0), (0, 0), (0, Mp - Msp)))
    grid = (N, Mp // tile_m)

    out = pl.pallas_call(
        _conv_bn_relu_kernel,
        out_shape=jax.ShapeDtypeStruct((N, C2, Mp), x.dtype),
        grid_spec=pltpu.PrefetchScalarGridSpec(
            num_scalar_prefetch=0,
            grid=grid,
            in_specs=[
                pl.BlockSpec((1, Kdim, tile_m), lambda n, m: (n, 0, m)),  # patches
                pl.BlockSpec((C2, Kdim), lambda n, m: (0, 0)),            # weights
                pl.BlockSpec((C2, 1), lambda n, m: (0, 0)),               # BN bias
            ],
            out_specs=pl.BlockSpec((1, C2, tile_m), lambda n, m: (n, 0, m)),
        ),
        compiler_params=pltpu.CompilerParams(
            dimension_semantics=("parallel", "parallel"),
            vmem_limit_bytes=32 * 1024 * 1024),
    )(patches, w2, bias2)

    if Mp != Msp:
        out = out[:, :, :Msp]
    return out.reshape(N, C2, Ho, Wo)                # already NCHW, free reshape


def _reference(x, weight, gamma, beta, running_mean, running_var,
               *, stride, padding, dilation, eps=1e-5):
    y = jax.lax.conv_general_dilated(
        x, weight,
        window_strides=(stride, stride),
        padding=[(padding, padding), (padding, padding)],
        rhs_dilation=(dilation, dilation),
        dimension_numbers=("NCHW", "OIHW", "NCHW"))
    scale = (gamma / jnp.sqrt(running_var + eps)).reshape(1, -1, 1, 1)
    bias = (beta - running_mean * gamma / jnp.sqrt(running_var + eps)).reshape(1, -1, 1, 1)
    return jnp.maximum(y * scale + bias, 0.0)


if __name__ == "__main__":
    # Module config: conv_bn_relu(c1=4, c2=8, k=3, s=1, p=1, d=1, g=1)
    N, C1, H, W = 2, 4, 16, 16
    C2, K = 8, 3
    stride, padding, dilation = 1, 1, 1

    key = jax.random.PRNGKey(0)
    kx, kw, kg, kb, km, kv = jax.random.split(key, 6)

    x = jax.random.normal(kx, (N, C1, H, W), dtype=jnp.float32)
    weight = jax.random.normal(kw, (C2, C1, K, K), dtype=jnp.float32) * 0.1
    gamma = 0.5 + jax.random.uniform(kg, (C2,), dtype=jnp.float32)
    beta = 0.1 * jax.random.normal(kb, (C2,), dtype=jnp.float32)
    running_mean = 0.1 * jax.random.normal(km, (C2,), dtype=jnp.float32)
    running_var = 0.5 + jax.random.uniform(kv, (C2,), dtype=jnp.float32)

    fn = jax.jit(functools.partial(
        conv_bn_relu, stride=stride, padding=padding, dilation=dilation))
    out = fn(x, weight, gamma, beta, running_mean, running_var)
    out = jax.block_until_ready(out)

    ref = _reference(x, weight, gamma, beta, running_mean, running_var,
                     stride=stride, padding=padding, dilation=dilation)
    assert out.shape == (N, C2, H, W), out.shape
    # bf16 operand streams (f32 accumulation) -> loosened tolerance vs f32 ref.
    assert jnp.allclose(out, ref, atol=5e-2, rtol=5e-2), \
        float(jnp.max(jnp.abs(out - ref)))

    print("KERNEL_OK")
</pallas_src>

<mosaic_0001>
module attributes {stable_mosaic.version = 11 : i64} {
  func.func @_conv_bn_relu_kernel(%arg0: i32, %arg1: i32, %arg2: memref<1x36x256xbf16, #tpu.memory_space<vmem>>, %arg3: memref<8x36xbf16, #tpu.memory_space<vmem>>, %arg4: memref<8x1xf32, #tpu.memory_space<vmem>>, %arg5: memref<1x8x256xf32, #tpu.memory_space<vmem>>) attributes {dimension_semantics = [#tpu.dimension_semantics<parallel>, #tpu.dimension_semantics<parallel>], iteration_bounds = array<i64: 2, 1>, scalar_prefetch = 0 : i64, scratch_operands = 0 : i64, tpu.core_type = #tpu.core_type<tc>, window_params = [{transform_indices = @transform_0, window_bounds = array<i64: 1, 36, 256>}, {pipeline_mode = #tpu.pipeline_mode<synchronous>, transform_indices = @transform_1, window_bounds = array<i64: 8, 36>}, {pipeline_mode = #tpu.pipeline_mode<synchronous>, transform_indices = @transform_2, window_bounds = array<i64: 8, 1>}, {transform_indices = @transform_3, window_bounds = array<i64: 1, 8, 256>}]} {
    %c0 = arith.constant 0 : index
    %c0_0 = arith.constant 0 : index
    %0 = vector.load %arg3[%c0, %c0_0] : memref<8x36xbf16, #tpu.memory_space<vmem>>, vector<8x36xbf16>
    %c0_1 = arith.constant 0 : index
    %c0_2 = arith.constant 0 : index
    %c0_3 = arith.constant 0 : index
    %1 = vector.load %arg2[%c0_1, %c0_2, %c0_3] : memref<1x36x256xbf16, #tpu.memory_space<vmem>>, vector<1x36x256xbf16>
    %2 = vector.shape_cast %1 : vector<1x36x256xbf16> to vector<36x256xbf16>
    %cst = arith.constant dense<0.000000e+00> : vector<8x256xf32>
    %3 = tpu.matmul %0, %2, %cst {dimension_numbers = #tpu.dot_dimension_numbers<[1], [0], [0], [1], [0, 0, 1, 1], [], []>} : vector<8x36xbf16>, vector<36x256xbf16>, vector<8x256xf32> -> vector<8x256xf32>
    %c0_4 = arith.constant 0 : index
    %c0_5 = arith.constant 0 : index
    %4 = vector.load %arg4[%c0_4, %c0_5] : memref<8x1xf32, #tpu.memory_space<vmem>>, vector<8x1xf32>
    %5 = vector.broadcast %4 : vector<8x1xf32> to vector<8x256xf32>
    %6 = arith.addf %3, %5 : vector<8x256xf32>
    %cst_6 = arith.constant 0.000000e+00 : f32
    %7 = vector.broadcast %cst_6 : f32 to vector<8x256xf32>
    %8 = arith.maximumf %6, %7 : vector<8x256xf32>
    %c0_7 = arith.constant 0 : index
    %c0_8 = arith.constant 0 : index
    %c0_9 = arith.constant 0 : index
    %9 = vector.load %arg5[%c0_7, %c0_8, %c0_9] : memref<1x8x256xf32, #tpu.memory_space<vmem>>, vector<1x8x256xf32>
    %10 = vector.shape_cast %9 : vector<1x8x256xf32> to vector<8x256xf32>
    %11 = vector.shape_cast %8 : vector<8x256xf32> to vector<1x8x256xf32>
    tpu.vector_store %arg5[%c0_7, %c0_8, %c0_9], %11 {strides = array<i32>} : memref<1x8x256xf32, #tpu.memory_space<vmem>>, vector<1x8x256xf32>,
    return
  }
  func.func @transform_0(%arg0: i32, %arg1: i32) -> (i32, i32, i32) {
    %c0_i32 = arith.constant 0 : i32
    %c0_i32_0 = arith.constant 0 : i32
    return %arg0, %c0_i32, %arg1 : i32, i32, i32
  }
  func.func @transform_1(%arg0: i32, %arg1: i32) -> (i32, i32) {
    %c0_i32 = arith.constant 0 : i32
    %c0_i32_0 = arith.constant 0 : i32
    %c0_i32_1 = arith.constant 0 : i32
    return %c0_i32, %c0_i32_0 : i32, i32
  }
  func.func @transform_2(%arg0: i32, %arg1: i32) -> (i32, i32) {
    %c0_i32 = arith.constant 0 : i32
    %c0_i32_0 = arith.constant 0 : i32
    %c0_i32_1 = arith.constant 0 : i32
    return %c0_i32, %c0_i32_0 : i32, i32
  }
  func.func @transform_3(%arg0: i32, %arg1: i32) -> (i32, i32, i32) {
    %c0_i32 = arith.constant 0 : i32
    %c0_i32_0 = arith.constant 0 : i32
    return %arg0, %c0_i32, %arg1 : i32, i32, i32
  }
}

</mosaic_0001>

<bundles_post_ra>
// kernel: conv_bn_relu.1
= control target key start
LH: loop header
LB: loop body
LE: loop exit
PB: predicated region body
PF: predicated region fallthrough
CT: control target
= control target key end

     0   :  { %s490_s12 = smov 0   ;;  %s492_s13 = smov 0   ;;  %s529_s0 = inlined_call_operand.vmem [shape: bf16[2,36,256], index: 0, kind: input, shape index: {}]   ;;  %s530_s1 = inlined_call_operand.vmem [shape: bf16[8,36], index: 1, kind: input, shape index: {}]   ;;  %s531_s2 = inlined_call_operand.vmem [shape: f32[8,1], index: 2, kind: input, shape index: {}]   ;;  %s532_s3 = inlined_call_operand.vmem [shape: f32[2,8,256], index: 3, kind: output, shape index: {}]  }
   0x1   :  { %s494_s14 = smov 0  }
   0x2 LB: > { %s25_s15 = sadd.s32 1, %s463_s13  ;;  %p395_p0 = scmp.ge.s32.totalorder %s467_s14, 1  ;;  %s467_s14 = sphi %s494_s14, %s13_s14   ;;  %s463_s13 = sphi %s492_s13, %s534_s13   ;;  %s459_s12 = sphi %s490_s12, %s533_s12  }
   0x3   : > { %p27_p1 = scmp.ge.s32.totalorder %s25_s15, 2  ;;  %p158_p2 = scmp.lt.s32.totalorder %s467_s14, 3 }
   0x5   : > { %s536_s15 = smov (%p27_p1, %s25_s15), 0  ;;  %p159_p3 = pnand %p395_p0, %p158_p2 }
   0x6   : > { %p191_p4 = scmp.lt.s32.totalorder (!%p159_p3), %s459_s12, 1 }
   0x7   : > { %162 = sbr.rel (%p159_p3) target bundleno = 231 (0xe7), region = 32 }
   0xc   : > { %v469_v0 = vmov 0   ;;  %v217_v1 = vld [vmem:[%s531_s2] sm:$0xff]  ;;  %s538_s12 = smov (!%p191_p4, %s459_s12), 1  ;;  %vm252_vm0 = vcmask 1041408   ;;  %vm248_vm1 = vcmask 293888  }
   0xd   : > { %291 = vmatprep.mubr.bf16.mxu0 %v469_v0  ;;  %436 = vset.pattern.permute.xlu0 %v469_v0  ;;  %s410_s18 = smul.u32 40, %s538_s12  ;;  %v211_v10 = vld [vmem:[%s530_s1] sm:$0xf]  ;;  %s409_s24 = sshll.u32 %s538_s12, 4 }
   0xe   : > { %220 = vperm.xlu0 %436, %v217_v1   ;;  %s208_s27 = scalar_lea.vmem %s532_s3, %s409_s24 }
   0xf   : > { %s198_s21 = scalar_lea.vmem %s529_s0, %s410_s18 }
  0x10   : > { %v216_v2 = vld [vmem:[%s198_s21 + $0x20] sm:$0x33]  ;;  %v439_v5 = vld [vmem:[%s198_s21 + $0x14] ss:$8 sps:$4 sm:$0xff]   ;;  %v441_v7 = vld [vmem:[%s198_s21 + $0x10] ss:$8 sps:$4 sm:$0xff]  }
  0x11   : > { %v404_v3 = vcombine.high %v216_v2, %v216_v2  ;;  %v403_v4 = vcombine.low %v216_v2, %v216_v2  ;;  %v442_v8 = vld [vmem:[%s198_s21 + $0x4] ss:$8 sps:$4 sm:$0xff]   ;;  %v444_v9 = vld [vmem:[%s198_s21] ss:$8 sps:$4 sm:$0xff]  }
  0x13   : > { %405 = vmatprep.subr.msk.bf16.mxu0 %vm252_vm0, %v404_v3  ;;  %v254_v6 = vsel %vm252_vm0, %v403_v4, 0 }
  0x14   : > { %270 = vmatpush1.bf16.msra.mxu0 %v254_v6 }
  0x15   : > { %271 = vmatprep.subr.bf16.mxu0 %v439_v5 }
  0x18   : > { %272 = vmatpush1.bf16.msra.mxu0 %v441_v7 }
  0x19   : > { %273 = vmatprep.subr.bf16.mxu0 %v442_v8 }
  0x1c   : > { %274 = vmatpush1.bf16.msra.mxu0 %v444_v9 }
  0x1f   : > { %406 = vmatmul.mubr.msk.bf16.vlgmr.msra.gmra.mxu0 %vm248_vm1, %v211_v10 }
  0x89   : > { %v221_v11 = vpop.permute.xlu0 %220 }
  0xdf   : > { %v293_v12 = vpop.f32.mrf.mxu0 }
  0xe0   : > { %v294_v13 = vadd.f32 %v293_v12, %v221_v11 }
  0xe1   : > { %v295_v14 = vpop.f32.mrf.mxu0 }
  0xe2   : > { %v300_v15 = vmax.f32 %v294_v13, 0.0  ;;  %v296_v16 = vadd.f32 %v295_v14, %v221_v11 }
  0xe3   : > { %v297_v17 = vpop.f32.mrf.mxu0 }
  0xe4   : > { %302 = vst [vmem:[%s208_s27] sm:$0xff] %v300_v15  ;;  %v301_v18 = vmax.f32 %v296_v16, 0.0 }
  0xe5   : > { %v298_v19 = vpop.f32.mrf.mxu0 }
  0xe6   : > { %303 = vst [vmem:[%s208_s27 + $0x8] sm:$0xff] %v301_v18 }
  0xe7 PF: > { %s13_s14 = sadd.s32 1, %s467_s14   ;;  %s533_s12 = smov %s463_s13 }
  0xe8   : > { %p10_p5 = scmp.ge.s32.totalorder %s13_s14, 4   ;;  %s534_s13 = smov %s536_s15 }
  0xea   :  { %12 = sbr.rel (!%p10_p5) target bundleno = 2 (0x2), region = 62 }

</bundles_post_ra>
